<compile_context>
chip_gen: v7x
topology: tpu7x:2x2x1
jax: 0.10.0
libtpu: 0.0.40
codegen_flags: <defaults>
</compile_context>

<pallas_src>
import jax
import jax.numpy as jnp
from jax.experimental import pallas as pl
from jax.experimental.pallas import tpu as pltpu


def folded_linear_kernel(x_ref, w_ref, b_ref, o_ref):
    """x_ref: (TM, IN) activations; w_ref: (1, IN) bf16 folded weight row;
    b_ref: (1, 1) f32 scalar in SMEM; o_ref: (1, 1, TM) f32 (lane-dense row)."""
    x_bf = x_ref[...].astype(jnp.bfloat16)        # in-kernel cast; compute has slack
    # (1, IN) x (TM, IN) contracting IN (the q @ k^T MXU pattern) -> (1, TM),
    # which is already lane-dense so the store is an unmasked full-lane write.
    y = jnp.einsum("od,td->ot", w_ref[...], x_bf,
                   preferred_element_type=jnp.float32)
    o_ref[0] = y + b_ref[0, 0]                    # scalar bias from SMEM


def _round_up(n, m):
    return ((n + m - 1) // m) * m


def linear_model_forward(x, w1, b1, w2, b2, *, tm_max=1024):
    """x: [B, 2048]; w1: [2048,128] or PyTorch [128,2048]; b1: [128]/[1,128];
    w2: [128,1], [1,128] or [128]; b2: [1]/[1,1]."""
    B, in_f = x.shape

    # --- Normalize weight layouts (explicit transpose for PyTorch [out, in]) ---
    if w1.shape[0] == in_f:
        w1_m, hid = w1, w1.shape[1]
    elif w1.shape[1] == in_f:
        w1_m, hid = w1.T, w1.shape[0]             # PyTorch nn.Linear layout
    else:
        raise ValueError(f"w1 shape {w1.shape} incompatible with x {x.shape}")
    if w2.shape == (hid, 1):
        w2_flat = w2[:, 0]
    elif w2.shape == (1, hid):
        w2_flat = w2[0, :]
    elif w2.shape == (hid,):
        w2_flat = w2
    else:
        raise ValueError(f"w2 shape {w2.shape} incompatible with hidden={hid}")
    b1_flat = jnp.asarray(b1, jnp.float32).reshape(hid)
    b2_scalar = jnp.asarray(b2, jnp.float32).reshape(())

    # --- Fold fc2 into fc1 (exact: no nonlinearity between the layers) ---
    hi = jax.lax.Precision.HIGHEST
    w2f = w2_flat.astype(jnp.float32)
    w_row = jnp.dot(jnp.asarray(w1_m, jnp.float32), w2f,
                    precision=hi).reshape(1, in_f).astype(jnp.bfloat16)
    b_eff = (jnp.dot(b1_flat, w2f, precision=hi)
             + b2_scalar).reshape(1, 1).astype(jnp.float32)

    # --- Batch tiling ---
    if B <= 128:
        tm = B                                    # full-dim block, single step
    elif B <= tm_max:
        tm = _round_up(pl.cdiv(B, 2), 8)          # >=2 steps -> v7x megacore gets work
    else:
        tm = tm_max
    num_tiles = pl.cdiv(B, tm)
    grid = (num_tiles,)

    flops = 2 * B * in_f + B
    bytes_accessed = (x.size * x.dtype.itemsize + w_row.size * 2
                      + b_eff.size * 4 + num_tiles * tm * 4)

    out_tiles = pl.pallas_call(
        folded_linear_kernel,
        out_shape=jax.ShapeDtypeStruct((num_tiles, 1, tm), jnp.float32),
        grid_spec=pltpu.PrefetchScalarGridSpec(
            num_scalar_prefetch=0,
            grid=grid,
            in_specs=[
                pl.BlockSpec((tm, in_f), lambda i: (i, 0)),          # x tile streams
                pl.BlockSpec((1, in_f), lambda i: (0, 0)),           # folded weight row
                pl.BlockSpec(memory_space=pltpu.MemorySpace.SMEM),   # folded bias scalar
            ],
            out_specs=pl.BlockSpec((1, 1, tm), lambda i: (i, 0, 0)),  # lane-dense row
        ),
        compiler_params=pltpu.CompilerParams(
            dimension_semantics=("parallel",),     # independent batch tiles
            vmem_limit_bytes=32 * 1024 * 1024,     # tm=1024 f32 double-buffer fits v5e too
        ),
        cost_estimate=pl.CostEstimate(
            flops=flops, transcendentals=0, bytes_accessed=bytes_accessed),
    )(x, w_row, b_eff)

    return out_tiles.reshape(-1)[:B].reshape(B, 1)


if __name__ == "__main__":
    key = jax.random.PRNGKey(0)
    k_x, k_w1, k_b1, k_w2, k_b2 = jax.random.split(key, 5)

    B, IN, HID, OUT = 8, 2048, 128, 1
    x = jax.random.normal(k_x, (B, IN), dtype=jnp.float32)

    # Deterministic init mimicking nn.Linear's uniform(-1/sqrt(fan_in), 1/sqrt(fan_in)).
    bound1 = 1.0 / jnp.sqrt(float(IN))
    w1 = jax.random.uniform(k_w1, (IN, HID), jnp.float32, -bound1, bound1)
    b1 = jax.random.uniform(k_b1, (1, HID), jnp.float32, -bound1, bound1)
    bound2 = 1.0 / jnp.sqrt(float(HID))
    w2 = jax.random.uniform(k_w2, (HID, OUT), jnp.float32, -bound2, bound2)
    b2 = jax.random.uniform(k_b2, (1, OUT), jnp.float32, -bound2, bound2)

    out = linear_model_forward(x, w1, b1, w2, b2)
    out = jax.block_until_ready(out)
    assert out.shape == (B, 1)

    # f32 reference at highest precision; kernel uses bf16 inputs + f32 accumulation.
    hi = jax.lax.Precision.HIGHEST
    ref = jnp.dot(jnp.dot(x, w1, precision=hi) + b1, w2, precision=hi) + b2
    assert jnp.allclose(out, ref, atol=5e-3, rtol=5e-3), float(jnp.max(jnp.abs(out - ref)))

    # PyTorch-layout weights ([out_features, in_features]) must give the same result
    # (exercises the explicit-transpose fix from the correctness review).
    out_pt = linear_model_forward(x, w1.T, b1.reshape(HID), w2.T, b2.reshape(OUT))
    out_pt = jax.block_until_ready(out_pt)
    assert jnp.allclose(out, out_pt, atol=1e-6, rtol=1e-6)

    print("KERNEL_OK")
</pallas_src>

<mosaic_0001>
module attributes {stable_mosaic.version = 11 : i64} {
  func.func @folded_linear_kernel(%arg0: i32, %arg1: memref<8x2048xf32, #tpu.memory_space<vmem>>, %arg2: memref<1x2048xbf16, #tpu.memory_space<vmem>>, %arg3: memref<1x1xf32, #tpu.memory_space<smem>>, %arg4: memref<1x1x8xf32, #tpu.memory_space<vmem>>) attributes {dimension_semantics = [#tpu.dimension_semantics<parallel>], iteration_bounds = array<i64: 1>, scalar_prefetch = 0 : i64, scratch_operands = 0 : i64, tpu.core_type = #tpu.core_type<tc>, window_params = [{transform_indices = @transform_0, window_bounds = array<i64: 8, 2048>}, {pipeline_mode = #tpu.pipeline_mode<synchronous>, transform_indices = @transform_1, window_bounds = array<i64: 1, 2048>}, {transform_indices = @transform_2, window_bounds = array<i64: 1, 1>}, {transform_indices = @transform_3, window_bounds = array<i64: 1, 1, 8>}]} {
    %c0 = arith.constant 0 : index
    %c0_0 = arith.constant 0 : index
    %0 = vector.load %arg1[%c0, %c0_0] : memref<8x2048xf32, #tpu.memory_space<vmem>>, vector<8x2048xf32>
    %1 = arith.truncf %0 : vector<8x2048xf32> to vector<8x2048xbf16>
    %c0_1 = arith.constant 0 : index
    %c0_2 = arith.constant 0 : index
    %2 = vector.load %arg2[%c0_1, %c0_2] : memref<1x2048xbf16, #tpu.memory_space<vmem>>, vector<1x2048xbf16>
    "tpu.trace_start"() <{level = 10 : i32, message = "od,td->ot"}> : () -> ()
    %cst = arith.constant dense<0.000000e+00> : vector<1x8xf32>
    %3 = tpu.matmul %2, %1, %cst {dimension_numbers = #tpu.dot_dimension_numbers<[1], [1], [0], [0], [0, 0, 1, 0], [], []>} : vector<1x2048xbf16>, vector<8x2048xbf16>, vector<1x8xf32> -> vector<1x8xf32>
    "tpu.trace_stop"() : () -> ()
    %c0_3 = arith.constant 0 : index
    %c0_4 = arith.constant 0 : index
    %4 = memref.load %arg3[%c0_3, %c0_4] : memref<1x1xf32, #tpu.memory_space<smem>>
    %5 = vector.broadcast %4 : f32 to vector<1x8xf32>
    %6 = arith.addf %3, %5 : vector<1x8xf32>
    %c0_5 = arith.constant 0 : index
    %c0_6 = arith.constant 0 : index
    %c0_7 = arith.constant 0 : index
    %7 = vector.load %arg4[%c0_5, %c0_6, %c0_7] : memref<1x1x8xf32, #tpu.memory_space<vmem>>, vector<1x1x8xf32>
    %8 = vector.shape_cast %7 : vector<1x1x8xf32> to vector<1x8xf32>
    %9 = vector.shape_cast %6 : vector<1x8xf32> to vector<1x1x8xf32>
    tpu.vector_store %arg4[%c0_5, %c0_6, %c0_7], %9 {strides = array<i32>} : memref<1x1x8xf32, #tpu.memory_space<vmem>>, vector<1x1x8xf32>,
    return
  }
  func.func @transform_0(%arg0: i32) -> (i32, i32) {
    %c0_i32 = arith.constant 0 : i32
    %c0_i32_0 = arith.constant 0 : i32
    return %arg0, %c0_i32 : i32, i32
  }
  func.func @transform_1(%arg0: i32) -> (i32, i32) {
    %c0_i32 = arith.constant 0 : i32
    %c0_i32_0 = arith.constant 0 : i32
    %c0_i32_1 = arith.constant 0 : i32
    return %c0_i32, %c0_i32_0 : i32, i32
  }
  func.func @transform_2(%arg0: i32) -> (i32, i32) {
    %c0_i32 = arith.constant 0 : i32
    %c0_i32_0 = arith.constant 0 : i32
    %c0_i32_1 = arith.constant 0 : i32
    return %c0_i32, %c0_i32_0 : i32, i32
  }
  func.func @transform_3(%arg0: i32) -> (i32, i32, i32) {
    %c0_i32 = arith.constant 0 : i32
    %c0_i32_0 = arith.constant 0 : i32
    %c0_i32_1 = arith.constant 0 : i32
    return %arg0, %c0_i32, %c0_i32_0 : i32, i32, i32
  }
}

</mosaic_0001>

<bundles_post_ra>
// kernel: tpu_custom_call.1
= control target key start
LH: loop header
LB: loop body
LE: loop exit
PB: predicated region body
PF: predicated region fallthrough
CT: control target
= control target key end

     0   :  { %9 = vsyncpa [#allocation4], 0  ;;  %s712_s0 = inlined_call_operand.hbm [shape: f32[8,2048], index: 0, kind: input, shape index: {}]   ;;  %s713_s1 = inlined_call_operand.hbm [shape: bf16[1,2048], index: 1, kind: input, shape index: {}]   ;;  %s714_s2 = inlined_call_operand.<no memory space> [shape: f32[1,1], index: 2, kind: input, shape index: {}]   ;;  %s715_s3 = inlined_call_operand.hbm [shape: f32[1,1,8], index: 3, kind: output, shape index: {}]  }
   0x1   :  { %10 = vsyncpa [#allocation7], 0 }
   0x2   :  { %11 = vsyncpa [#allocation5], 0  ;;  %s635_s12 = smov [#allocation3]   ;;  %s636_s14 = smov [#allocation6]  }
   0x3   :  { %s18_s13 = sshll.u32 %s635_s12, 4  ;;  %s28_s15 = sshll.u32 %s636_s14, 4  ;;  %s19_s13 = int_to_ptr.vmem [resolvable:$true] %s18_s13  ;;  %s29_s15 = int_to_ptr.vmem [resolvable:$true] %s28_s15 }
   0x4   :  { %s563_s18 = scalar_lea.hbm %s712_s0, 2048 }
   0x5   :  { %p564_p0 = scmp.ne.s32.totalorder %s712_s0, %s563_s18  ;;  %p567_p1 = scmp.lt.u32.totalorder %s563_s18, %s712_s0 }
   0x7   :  { %p569_p2 = pnand %p567_p1, %p564_p0 }
   0x9   :  { %572 = shalt.err (!%p569_p2)
}
   0xa   :  { %s573_s23 = scalar_lea.vmem %s19_s13, 2048  ;;  %p578_p4 = scmp.lt.s32.totalorder %s19_s13, %s19_s13 }
   0xb   :  { %p574_p3 = scmp.ne.s32.totalorder %s19_s13, %s573_s23  ;;  %p579_p5 = scmp.lt.s32.totalorder %s573_s23, %s573_s23 }
   0xd   :  { %p580_p6 = por %p579_p5, %p578_p4 }
   0xf   :  { %p581_p7 = pnand %p580_p6, %p574_p3 }
  0x11   :  { %584 = shalt.err (!%p581_p7)
}
  0x12   :  { %21 = dma.hbm_to_vmem [thread:$0]  %s712_s0, 2048, %s19_s13, [#allocation4]  }
  0x13   :  { %s585_s28 = scalar_lea.hbm %s713_s1, 256 }
  0x14   :  { %p586_p8 = scmp.ne.s32.totalorder %s713_s1, %s585_s28  ;;  %p589_p9 = scmp.lt.u32.totalorder %s585_s28, %s713_s1 }
  0x16   :  { %p591_p10 = pnand %p589_p9, %p586_p8 }
  0x18   :  { %594 = shalt.err (!%p591_p10)
}
  0x19   :  { %s595_s6 = scalar_lea.vmem %s29_s15, 256  ;;  %p600_p12 = scmp.lt.s32.totalorder %s29_s15, %s29_s15 }
  0x1a   :  { %p596_p11 = scmp.ne.s32.totalorder %s29_s15, %s595_s6  ;;  %p601_p13 = scmp.lt.s32.totalorder %s595_s6, %s595_s6 }
  0x1c   :  { %p602_p0 = por %p601_p13, %p600_p12 }
  0x1e   :  { %p603_p1 = pnand %p602_p0, %p596_p11 }
  0x20   :  { %606 = shalt.err (!%p603_p1)
}
  0x21   :  { %31 = dma.hbm_to_vmem [thread:$0]  %s713_s1, 256, %s29_s15, [#allocation7]  }
  0x22   :  { %629 = dma.done.wait [#allocation4], 2048  }
  0x23   :  { %630 = vsyncadd [#allocation4], 4294965248 }
  0x24   :  { %631 = dma.done.wait [#allocation7], 256  }
  0x25   :  { %632 = vsyncadd [#allocation7], 4294967040  ;;  %v83_v0 = vlaneseq  ;;  %v637_v1 = vmov 1966171168   ;;  %v42_v6 = vld [vmem:[#allocation3 + $0x8] sm:$0xff]  ;;  %v41_v8 = vld [vmem:[#allocation3] sm:$0xff] }
  0x26   :  { %v81_v2 = vunpack.c.l.s4 %v637_v1  ;;  %v50_v7 = vld [vmem:[#allocation3 + $0x48] sm:$0xff]  ;;  %v58_v9 = vpack.c.bf16 %v42_v6, %v42_v6  ;;  %v57_v11 = vpack.c.bf16 %v41_v8, %v41_v8  ;;  %v49_v12 = vld [vmem:[#allocation3 + $0x40] sm:$0xff]  ;;  %v44_v17 = vld [vmem:[#allocation3 + $0x18] sm:$0xff]  ;;  %s638_s9 = smov [#allocation8]   ;;  %vm513_vm0 = vcmask 57344  }
  0x27   :  { %v84_v3 = vshrl.u32 %v83_v0, 7  ;;  %v66_v10 = vpack.c.bf16 %v50_v7, %v50_v7  ;;  %v73_v13 = vld [vmem:[#allocation6] sm:$0xff]  ;;  %v74_v14 = vld [vmem:[#allocation6 + $0x8] sm:$0xff]  ;;  %v65_v15 = vpack.c.bf16 %v49_v12, %v49_v12  ;;  %v52_v18 = vld [vmem:[#allocation3 + $0x58] sm:$0xff]  ;;  %v60_v20 = vpack.c.bf16 %v44_v17, %v44_v17  ;;  %s521_s10 = sshll.u32 %s638_s9, 4  ;;  %s522_s10 = int_to_ptr.vmem [resolvable:$true] %s521_s10 }
  0x28   :  { %v82_v4 = vunpack.c.0.s8 %v81_v2  ;;  %193 = vmatprep.subr.bf16.mxu1 %v58_v9  ;;  %v68_v22 = vpack.c.bf16 %v52_v18, %v52_v18  ;;  %v43_v24 = vld [vmem:[#allocation3 + $0x10] sm:$0xff]  ;;  %v46_v30 = vld [vmem:[#allocation3 + $0x28] sm:$0xff]  ;;  %v79_v34 = vcombine.high %v73_v13, %v73_v13  ;;  %v128_v36 = vcombine.high %v74_v14, %v74_v14  ;;  %v45_v42 = vld [vmem:[#allocation3 + $0x20] sm:$0xff]  ;;  %s607_s11 = scalar_lea.vmem %s522_s10, 16  ;;  %s611_s12 = scalar_lea.vmem %s522_s10, 32 }
  0x29   :  { %353 = vmatprep.subr.bf16.mxu0 %v66_v10  ;;  %194 = vmatpush1.bf16.xpose.msra.mxu1 %v57_v11  ;;  %v51_v25 = vld [vmem:[#allocation3 + $0x50] sm:$0xff]  ;;  %v54_v31 = vld [vmem:[#allocation3 + $0x68] sm:$0xff]  ;;  %v59_v32 = vpack.c.bf16 %v43_v24, %v43_v24  ;;  %v62_v38 = vpack.c.bf16 %v46_v30, %v46_v30  ;;  %v53_v43 = vld [vmem:[#allocation3 + $0x60] sm:$0xff]  ;;  %v61_v50 = vpack.c.bf16 %v45_v42, %v45_v42  ;;  %v76_v2 = vstv %s714_s2  ;;  %p608_p2 = scmp.ne.s32.totalorder %s522_s10, %s607_s11  ;;  %p612_p3 = scmp.lt.s32.totalorder %s522_s10, %s522_s10 }
  0x2a   :  { %v683_v5 = vsub.s32 %v82_v4, %v84_v3  ;;  %354 = vmatpush1.bf16.xpose.msra.mxu0 %v65_v15  ;;  %233 = vmatprep.subr.bf16.mxu1 %v60_v20  ;;  %v67_v33 = vpack.c.bf16 %v51_v25, %v51_v25  ;;  %v70_v39 = vpack.c.bf16 %v54_v31, %v54_v31  ;;  %v48_v48 = vld [vmem:[#allocation3 + $0x38] sm:$0xff]  ;;  %v47_v56 = vld [vmem:[#allocation3 + $0x30] sm:$0xff]  ;;  %p613_p4 = scmp.lt.s32.totalorder %s611_s12, %s607_s11 }
  0x2b   :  { %393 = vmatprep.subr.bf16.mxu0 %v68_v22  ;;  %v56_v49 = vld [vmem:[#allocation3 + $0x78] sm:$0xff]  ;;  %v69_v51 = vpack.c.bf16 %v53_v43, %v53_v43  ;;  %v64_v54 = vpack.c.bf16 %v48_v48, %v48_v48  ;;  %v55_v57 = vld [vmem:[#allocation3 + $0x70] sm:$0xff]  ;;  %v63_v60 = vpack.c.bf16 %v47_v56, %v47_v56 }
  0x2c   :  { %v86_v16 = vrot.slane %v73_v13, %v683_v5  ;;  %v135_v19 = vrot.slane %v74_v14, %v683_v5  ;;  %v93_v40 = vrot.slane %v79_v34, %v683_v5  ;;  %v142_v41 = vrot.slane %v128_v36, %v683_v5  ;;  %p614_p5 = por %p613_p4, %p612_p3 }
  0x2d   :  { %v72_v55 = vpack.c.bf16 %v56_v49, %v56_v49  ;;  %v71_v61 = vpack.c.bf16 %v55_v57, %v55_v57 }
  0x2e   :  { %v94_v21 = vcombine.high %v86_v16, %v86_v16  ;;  %v143_v23 = vcombine.high %v135_v19, %v135_v19  ;;  %v102_v28 = vrot.slane %v86_v16, %v683_v5  ;;  %v151_v29 = vrot.slane %v135_v19, %v683_v5  ;;  %p615_p6 = pnand %p614_p5, %p608_p2 }
  0x2f   :  { %v95_v44 = vcombine.high %v93_v40, %v93_v40  ;;  %v144_v45 = vcombine.high %v142_v41, %v142_v41  ;;  %v109_v58 = vrot.slane %v93_v40, %v683_v5  ;;  %v158_v59 = vrot.slane %v142_v41, %v683_v5 }
  0x30   :  { %v116_v26 = vrot.slane %v94_v21, %v683_v5  ;;  %v165_v27 = vrot.slane %v143_v23, %v683_v5  ;;  %v124_v46 = vcombine.high %v102_v28, %v102_v28  ;;  %v173_v47 = vcombine.high %v151_v29, %v151_v29 }
  0x31   :  { %v123_v52 = vrot.slane %v95_v44, %v683_v5  ;;  %v172_v53 = vrot.slane %v144_v45, %v683_v5  ;;  %v125_v0 = vcombine.high %v109_v58, %v109_v58  ;;  %v174_v1 = vcombine.high %v158_v59, %v158_v59 }
  0x32   :  { %225 = vmatprep.mubr.bf16.mxu1 %v116_v26  ;;  %v126_v35 = vcombine.high %v116_v26, %v116_v26  ;;  %v175_v37 = vcombine.high %v165_v27, %v165_v27  ;;  %385 = vmatprep.mubr.bf16.mxu0 %v165_v27 }
  0x33   :  { %226 = vmatmul.mubr.bf16.vlgmr.msra.gmra.mrb[0].mxu1 %v102_v28  ;;  %386 = vmatmul.mubr.bf16.vlgmr.msra.gmra.mrb[0].mxu0 %v151_v29  ;;  %v127_v62 = vcombine.high %v123_v52, %v123_v52  ;;  %v176_v63 = vcombine.high %v172_v53, %v172_v53 }
  0x34   :  { %234 = vmatpush1.bf16.xpose.msra.mxu1 %v59_v32  ;;  %394 = vmatpush1.bf16.xpose.msra.mxu0 %v67_v33 }
  0x35   :  { %265 = vmatprep.mubr.bf16.mxu1 %v126_v35  ;;  %425 = vmatprep.mubr.bf16.mxu0 %v175_v37 }
  0x36   :  { %273 = vmatprep.subr.bf16.mxu1 %v62_v38  ;;  %433 = vmatprep.subr.bf16.mxu0 %v70_v39 }
  0x3f   :  { %266 = vmatmul.mubr.bf16.vlgmr.msra.gmra.mrb[0].mxu1 %v124_v46  ;;  %426 = vmatmul.mubr.bf16.vlgmr.msra.gmra.mrb[0].mxu0 %v173_v47 }
  0x40   :  { %274 = vmatpush1.bf16.xpose.msra.mxu1 %v61_v50  ;;  %434 = vmatpush1.bf16.xpose.msra.mxu0 %v69_v51 }
  0x41   :  { %305 = vmatprep.mubr.bf16.mxu1 %v123_v52  ;;  %465 = vmatprep.mubr.bf16.mxu0 %v172_v53 }
  0x42   :  { %313 = vmatprep.subr.bf16.mxu1 %v64_v54  ;;  %473 = vmatprep.subr.bf16.mxu0 %v72_v55 }
  0x4b   :  { %306 = vmatmul.mubr.bf16.vlgmr.msra.gmra.mrb[0].mxu1 %v109_v58  ;;  %466 = vmatmul.mubr.bf16.vlgmr.msra.gmra.mrb[0].mxu0 %v158_v59 }
  0x4c   :  { %314 = vmatpush1.bf16.xpose.msra.mxu1 %v63_v60  ;;  %474 = vmatpush1.bf16.xpose.msra.mxu0 %v71_v61 }
  0x4d   :  { %345 = vmatprep.mubr.bf16.mxu1 %v127_v62  ;;  %505 = vmatprep.mubr.bf16.mxu0 %v176_v63 }
  0x57   :  { %346 = vmatmul.mubr.bf16.vlgmr.msra.gmra.mrb[0].mxu1 %v125_v0  ;;  %506 = vmatmul.mubr.bf16.vlgmr.msra.gmra.mrb[0].mxu0 %v174_v1 }
 0x12a   :  { %v347_v3 = vpop.f32.mrb[0].mxu1  ;;  %v507_v4 = vpop.f32.mrb[0].mxu0 }
 0x12b   :  { %v531_v5 = vadd.f32 %v347_v3, %v76_v2  ;;  %v349_v6 = vpop.f32.mrb[1].mxu1  ;;  %v509_v7 = vpop.f32.mrb[1].mxu0 }
 0x12c   :  { %v350_v8 = vpop.f32.mrb[2].mxu1  ;;  %v510_v9 = vpop.f32.mrb[2].mxu0 }
 0x12d   :  { %v532_v10 = vadd.f32 %v531_v5, %v507_v4  ;;  %v351_v11 = vpop.f32.mrb[3].mxu1  ;;  %v511_v12 = vpop.f32.mrb[3].mxu0 }
 0x12f   :  { %514 = vst.msk [vmem:[#allocation8] sm:$0x1] %vm513_vm0, %v532_v10 }
 0x130   :  { %618 = shalt.err (!%p615_p6)
}
 0x131   :  { %s619_s14 = scalar_lea.hbm %s715_s3, 16 }
 0x132   :  { %p620_p7 = scmp.ne.s32.totalorder %s715_s3, %s619_s14  ;;  %p623_p8 = scmp.lt.u32.totalorder %s619_s14, %s715_s3 }
 0x134   :  { %p625_p9 = pnand %p623_p8, %p620_p7 }
 0x136   :  { %628 = shalt.err (!%p625_p9)
}
 0x137   :  { %524 = dma.vmem_to_hbm [thread:$0]  %s522_s10, 16, %s715_s3, [#allocation5]  }
 0x138   :  { %633 = dma.done.wait [#allocation5], 16  }
 0x139   :  { %634 = vsyncadd [#allocation5], 4294967280 }
 0x13a   :  { %528 = vsyncpa [#allocation4], 1 }
 0x13b   :  { %529 = vsyncpa [#allocation7], 1 }
 0x13c   :  { %530 = vsyncpa [#allocation5], 1 }

</bundles_post_ra>
